<compile_context>
chip_gen: v7x
topology: tpu7x:2x2x1
jax: 0.10.0
libtpu: 0.0.40
codegen_flags: <defaults>
</compile_context>

<pallas_src>
import functools

import jax
import jax.numpy as jnp
from jax.experimental import pallas as pl
from jax.experimental.pallas import tpu as pltpu


def _round_up(n, m):
    return ((n + m - 1) // m) * m


def _mlp_kernel(x_ref, w1_ref, b1_ref, w2_ref, b2_ref, o_ref, *, compute_dtype):
    # lin1: x @ W1 + b1 (MXU, f32 accumulation)
    x = x_ref[...]
    w1 = w1_ref[...]
    if compute_dtype is not None:
        x = x.astype(compute_dtype)
        w1 = w1.astype(compute_dtype)
    h = jnp.dot(x, w1, preferred_element_type=jnp.float32)
    h = h + b1_ref[...].astype(jnp.float32)   # broadcast [1, H] over [TB, H]
    h = jnp.maximum(h, 0.0)                   # ReLU on the VPU, kept in f32

    # lin2: h @ W2 + b2
    w2 = w2_ref[...]
    if compute_dtype is not None:
        h = h.astype(compute_dtype)
        w2 = w2.astype(compute_dtype)
    out = jnp.dot(h, w2, preferred_element_type=jnp.float32)
    out = out + b2_ref[...].astype(jnp.float32)
    o_ref[...] = out.astype(o_ref.dtype)


def value_network_forward(x, w1, b1, w2, b2, *, block_b=2048, compute_dtype=None):
    """Fused MLP forward: relu(x @ w1 + b1) @ w2 + b2.

    x:  [B, input_dim]
    w1: [input_dim, hidden_dim], b1: [1, hidden_dim]
    w2: [hidden_dim, output_dim], b2: [1, output_dim]
    compute_dtype: optional dtype (e.g. jnp.bfloat16) for the matmul operands;
                   accumulation, bias-add and ReLU stay in float32.
    """
    B, in_dim = x.shape
    hid = w1.shape[1]
    out_dim = w2.shape[1]
    dt = x.dtype

    # Batch tile: multiple of 8 sublanes, capped by block_b; pad batch only when
    # the grid would not divide evenly (the feature dims stay at full extent, so
    # their blocks equal the full array dims and need no padding).
    tb = min(block_b, _round_up(B, 8))
    b_p = _round_up(B, tb)
    x_p = x if b_p == B else jnp.pad(x, ((0, b_p - B), (0, 0)))

    grid = (b_p // tb,)

    itemsize = jnp.dtype(dt).itemsize
    flops = 2 * b_p * (in_dim * hid + hid * out_dim)
    bytes_accessed = itemsize * (
        x_p.size + w1.size + b1.size + w2.size + b2.size + b_p * out_dim
    )

    kernel = functools.partial(_mlp_kernel, compute_dtype=compute_dtype)

    out_padded = pl.pallas_call(
        kernel,
        out_shape=jax.ShapeDtypeStruct((b_p, out_dim), dt),
        grid=grid,
        in_specs=[
            pl.BlockSpec((tb, in_dim), lambda i: (i, 0)),    # x tile, streamed
            pl.BlockSpec((in_dim, hid), lambda i: (0, 0)),   # w1 resident
            pl.BlockSpec((1, hid), lambda i: (0, 0)),        # b1 resident
            pl.BlockSpec((hid, out_dim), lambda i: (0, 0)),  # w2 resident
            pl.BlockSpec((1, out_dim), lambda i: (0, 0)),    # b2 resident
        ],
        out_specs=pl.BlockSpec((tb, out_dim), lambda i: (i, 0)),
        compiler_params=pltpu.CompilerParams(
            dimension_semantics=("parallel",),
            vmem_limit_bytes=64 * 1024 * 1024,
        ),
        cost_estimate=pl.CostEstimate(
            flops=flops, transcendentals=0, bytes_accessed=bytes_accessed
        ),
    )(x_p, w1, b1, w2, b2)

    return out_padded if b_p == B else out_padded[:B]


def init_params(key, input_dim, hidden_dim, output_dim, dtype=jnp.float32):
    """Deterministic init mimicking nn.Linear's U(-1/sqrt(fan_in), 1/sqrt(fan_in))."""
    k1, k2, k3, k4 = jax.random.split(key, 4)
    bound1 = 1.0 / (input_dim ** 0.5)
    bound2 = 1.0 / (hidden_dim ** 0.5)
    # Stored as [in, out] (transpose of PyTorch's [out, in]).
    w1 = jax.random.uniform(k1, (input_dim, hidden_dim), dtype, -bound1, bound1)
    b1 = jax.random.uniform(k2, (1, hidden_dim), dtype, -bound1, bound1)
    w2 = jax.random.uniform(k3, (hidden_dim, output_dim), dtype, -bound2, bound2)
    b2 = jax.random.uniform(k4, (1, output_dim), dtype, -bound2, bound2)
    return w1, b1, w2, b2


def reference_forward(x, w1, b1, w2, b2):
    h = jnp.maximum(x @ w1 + b1, 0.0)
    return h @ w2 + b2


# TODO(synk): ValueNetwork.save() is torch state_dict I/O; not a kernel concern.

if __name__ == "__main__":
    key = jax.random.PRNGKey(0)
    kx, kp, kb, kc = jax.random.split(key, 4)

    # Shapes consistent with the module (snake-ai style: state -> hidden -> actions).
    batch, input_dim, hidden_dim, output_dim = 2, 16, 32, 4

    x = jax.random.normal(kx, (batch, input_dim), dtype=jnp.float32)
    w1, b1, w2, b2 = init_params(kp, input_dim, hidden_dim, output_dim)

    # Small-batch path (single grid step, batch padded up to one 8-row tile).
    out = jax.block_until_ready(value_network_forward(x, w1, b1, w2, b2))
    ref = reference_forward(x, w1, b1, w2, b2)
    assert out.shape == (batch, output_dim)
    assert jnp.allclose(out, ref, atol=1e-5, rtol=1e-5)

    # Larger batch, multiple tiles (exercises the batch grid + pipelined x DMA).
    big_batch = 2048
    xb = jax.random.normal(kb, (big_batch, input_dim), dtype=jnp.float32)
    out_b = jax.block_until_ready(
        value_network_forward(xb, w1, b1, w2, b2, block_b=512))
    ref_b = reference_forward(xb, w1, b1, w2, b2)
    assert out_b.shape == (big_batch, output_dim)
    assert jnp.allclose(out_b, ref_b, atol=1e-4, rtol=1e-4)

    # Ragged batch (not a multiple of the tile) exercises the batch-pad path.
    ragged_batch = 1000
    xr = jax.random.normal(kc, (ragged_batch, input_dim), dtype=jnp.float32)
    out_r = jax.block_until_ready(
        value_network_forward(xr, w1, b1, w2, b2, block_b=256))
    ref_r = reference_forward(xr, w1, b1, w2, b2)
    assert out_r.shape == (ragged_batch, output_dim)
    assert jnp.allclose(out_r, ref_r, atol=1e-4, rtol=1e-4)

    # bf16 matmul operands (halves matmul-operand traffic), f32 accumulation.
    out_bf = jax.block_until_ready(
        value_network_forward(xb, w1, b1, w2, b2, block_b=512,
                              compute_dtype=jnp.bfloat16))
    assert jnp.allclose(out_bf, ref_b, atol=5e-2, rtol=5e-2)

    print("KERNEL_OK")
</pallas_src>

<mosaic_0001>
module attributes {stable_mosaic.version = 11 : i64} {
  func.func @_mlp_kernel(%arg0: i32, %arg1: memref<8x16xf32, #tpu.memory_space<vmem>>, %arg2: memref<16x32xf32, #tpu.memory_space<vmem>>, %arg3: memref<1x32xf32, #tpu.memory_space<vmem>>, %arg4: memref<32x4xf32, #tpu.memory_space<vmem>>, %arg5: memref<1x4xf32, #tpu.memory_space<vmem>>, %arg6: memref<8x4xf32, #tpu.memory_space<vmem>>) attributes {dimension_semantics = [#tpu.dimension_semantics<parallel>], iteration_bounds = array<i64: 1>, scalar_prefetch = 0 : i64, scratch_operands = 0 : i64, tpu.core_type = #tpu.core_type<tc>, window_params = [{transform_indices = @transform_0, window_bounds = array<i64: 8, 16>}, {pipeline_mode = #tpu.pipeline_mode<synchronous>, transform_indices = @transform_1, window_bounds = array<i64: 16, 32>}, {pipeline_mode = #tpu.pipeline_mode<synchronous>, transform_indices = @transform_2, window_bounds = array<i64: 1, 32>}, {pipeline_mode = #tpu.pipeline_mode<synchronous>, transform_indices = @transform_3, window_bounds = array<i64: 32, 4>}, {pipeline_mode = #tpu.pipeline_mode<synchronous>, transform_indices = @transform_4, window_bounds = array<i64: 1, 4>}, {transform_indices = @transform_5, window_bounds = array<i64: 8, 4>}]} {
    %c0 = arith.constant 0 : index
    %c0_0 = arith.constant 0 : index
    %0 = vector.load %arg1[%c0, %c0_0] : memref<8x16xf32, #tpu.memory_space<vmem>>, vector<8x16xf32>
    %c0_1 = arith.constant 0 : index
    %c0_2 = arith.constant 0 : index
    %1 = vector.load %arg2[%c0_1, %c0_2] : memref<16x32xf32, #tpu.memory_space<vmem>>, vector<16x32xf32>
    %cst = arith.constant dense<0.000000e+00> : vector<8x32xf32>
    %2 = tpu.matmul %0, %1, %cst {dimension_numbers = #tpu.dot_dimension_numbers<[1], [0], [0], [1], [0, 0, 1, 1], [], []>} : vector<8x16xf32>, vector<16x32xf32>, vector<8x32xf32> -> vector<8x32xf32>
    %c0_3 = arith.constant 0 : index
    %c0_4 = arith.constant 0 : index
    %3 = vector.load %arg3[%c0_3, %c0_4] : memref<1x32xf32, #tpu.memory_space<vmem>>, vector<1x32xf32>
    %4 = vector.broadcast %3 : vector<1x32xf32> to vector<8x32xf32>
    %5 = arith.addf %2, %4 : vector<8x32xf32>
    %cst_5 = arith.constant 0.000000e+00 : f32
    %6 = vector.broadcast %cst_5 : f32 to vector<8x32xf32>
    %7 = arith.maximumf %5, %6 : vector<8x32xf32>
    %c0_6 = arith.constant 0 : index
    %c0_7 = arith.constant 0 : index
    %8 = vector.load %arg4[%c0_6, %c0_7] : memref<32x4xf32, #tpu.memory_space<vmem>>, vector<32x4xf32>
    %cst_8 = arith.constant dense<0.000000e+00> : vector<8x4xf32>
    %9 = tpu.matmul %7, %8, %cst_8 {dimension_numbers = #tpu.dot_dimension_numbers<[1], [0], [0], [1], [0, 0, 1, 1], [], []>} : vector<8x32xf32>, vector<32x4xf32>, vector<8x4xf32> -> vector<8x4xf32>
    %c0_9 = arith.constant 0 : index
    %c0_10 = arith.constant 0 : index
    %10 = vector.load %arg5[%c0_9, %c0_10] : memref<1x4xf32, #tpu.memory_space<vmem>>, vector<1x4xf32>
    %11 = vector.broadcast %10 : vector<1x4xf32> to vector<8x4xf32>
    %12 = arith.addf %9, %11 : vector<8x4xf32>
    %c0_11 = arith.constant 0 : index
    %c0_12 = arith.constant 0 : index
    %13 = vector.load %arg6[%c0_11, %c0_12] : memref<8x4xf32, #tpu.memory_space<vmem>>, vector<8x4xf32>
    tpu.vector_store %arg6[%c0_11, %c0_12], %12 {strides = array<i32>} : memref<8x4xf32, #tpu.memory_space<vmem>>, vector<8x4xf32>,
    return
  }
  func.func @transform_0(%arg0: i32) -> (i32, i32) {
    %c0_i32 = arith.constant 0 : i32
    %c0_i32_0 = arith.constant 0 : i32
    return %arg0, %c0_i32 : i32, i32
  }
  func.func @transform_1(%arg0: i32) -> (i32, i32) {
    %c0_i32 = arith.constant 0 : i32
    %c0_i32_0 = arith.constant 0 : i32
    %c0_i32_1 = arith.constant 0 : i32
    return %c0_i32, %c0_i32_0 : i32, i32
  }
  func.func @transform_2(%arg0: i32) -> (i32, i32) {
    %c0_i32 = arith.constant 0 : i32
    %c0_i32_0 = arith.constant 0 : i32
    %c0_i32_1 = arith.constant 0 : i32
    return %c0_i32, %c0_i32_0 : i32, i32
  }
  func.func @transform_3(%arg0: i32) -> (i32, i32) {
    %c0_i32 = arith.constant 0 : i32
    %c0_i32_0 = arith.constant 0 : i32
    %c0_i32_1 = arith.constant 0 : i32
    return %c0_i32, %c0_i32_0 : i32, i32
  }
  func.func @transform_4(%arg0: i32) -> (i32, i32) {
    %c0_i32 = arith.constant 0 : i32
    %c0_i32_0 = arith.constant 0 : i32
    %c0_i32_1 = arith.constant 0 : i32
    return %c0_i32, %c0_i32_0 : i32, i32
  }
  func.func @transform_5(%arg0: i32) -> (i32, i32) {
    %c0_i32 = arith.constant 0 : i32
    %c0_i32_0 = arith.constant 0 : i32
    return %arg0, %c0_i32 : i32, i32
  }
}

</mosaic_0001>

<bundles_post_ra>
// kernel: tpu_custom_call.1
= control target key start
LH: loop header
LB: loop body
LE: loop exit
PB: predicated region body
PF: predicated region fallthrough
CT: control target
= control target key end

     0   :  { %10 = vsyncpa [#allocation3], 0  ;;  %s575_s0 = inlined_call_operand.hbm [shape: f32[8,16], index: 0, kind: input, shape index: {}]   ;;  %s576_s1 = inlined_call_operand.hbm [shape: f32[16,32], index: 1, kind: input, shape index: {}]   ;;  %s577_s2 = inlined_call_operand.hbm [shape: f32[1,32], index: 2, kind: input, shape index: {}]   ;;  %s578_s3 = inlined_call_operand.hbm [shape: f32[32,4], index: 3, kind: input, shape index: {}]   ;;  %s579_s4 = inlined_call_operand.hbm [shape: f32[1,4], index: 4, kind: input, shape index: {}]   ;;  %s580_s5 = inlined_call_operand.hbm [shape: f32[8,4], index: 5, kind: output, shape index: {}]  }
   0x1   :  { %11 = vsyncpa [#allocation6], 0 }
   0x2   :  { %12 = vsyncpa [#allocation9], 0 }
   0x3   :  { %13 = vsyncpa [#allocation4], 0  ;;  %s462_s18 = smov [#allocation5]   ;;  %s322_s22 = scalar_lea.hbm %s576_s1, 256 }
   0x4   :  { %s29_s19 = sshll.u32 %s462_s18, 4  ;;  %p323_p0 = scmp.ne.s32.totalorder %s576_s1, %s322_s22  ;;  %s30_s19 = int_to_ptr.vmem [resolvable:$true] %s29_s19 }
   0x5   :  { %p326_p1 = scmp.lt.u32.totalorder %s322_s22, %s576_s1 }
   0x7   :  { %p328_p2 = pnand %p326_p1, %p323_p0 }
   0x9   :  { %331 = shalt.err (!%p328_p2)
}
   0xa   :  { %s332_s27 = scalar_lea.vmem %s30_s19, 256  ;;  %p337_p4 = scmp.lt.s32.totalorder %s30_s19, %s30_s19 }
   0xb   :  { %p333_p3 = scmp.ne.s32.totalorder %s30_s19, %s332_s27  ;;  %p338_p5 = scmp.lt.s32.totalorder %s332_s27, %s332_s27 }
   0xd   :  { %p339_p6 = por %p338_p5, %p337_p4 }
   0xf   :  { %p340_p7 = pnand %p339_p6, %p333_p3 }
  0x11   :  { %343 = shalt.err (!%p340_p7)
}
  0x12   :  { %s463_s28 = smov 128   ;;  %s464_s29 = smov 8  }
  0x13   :  { %35 = dma.hbm_to_vmem [thread:$0]  %s576_s1, 256, %s30_s19, [#allocation6], %s463_s28, %s463_s28, %s464_s29  }
  0x14   :  { %s465_s7 = smov [#allocation8]   ;;  %s466_s9 = smov [#allocation2]  }
  0x15   :  { %s51_s8 = sshll.u32 %s465_s7, 4  ;;  %s20_s10 = sshll.u32 %s466_s9, 4  ;;  %s52_s8 = int_to_ptr.vmem [resolvable:$true] %s51_s8  ;;  %s21_s10 = int_to_ptr.vmem [resolvable:$true] %s20_s10 }
  0x16   :  { %s344_s13 = scalar_lea.hbm %s578_s3, 512 }
  0x17   :  { %p345_p8 = scmp.ne.s32.totalorder %s578_s3, %s344_s13  ;;  %p348_p9 = scmp.lt.u32.totalorder %s344_s13, %s578_s3 }
  0x19   :  { %p350_p10 = pnand %p348_p9, %p345_p8 }
  0x1b   :  { %353 = shalt.err (!%p350_p10)
}
  0x1c   :  { %s354_s1 = scalar_lea.vmem %s52_s8, 512  ;;  %p359_p12 = scmp.lt.s32.totalorder %s52_s8, %s52_s8 }
  0x1d   :  { %p355_p11 = scmp.ne.s32.totalorder %s52_s8, %s354_s1  ;;  %p360_p13 = scmp.lt.s32.totalorder %s354_s1, %s354_s1 }
  0x1f   :  { %p361_p0 = por %p360_p13, %p359_p12 }
  0x21   :  { %p362_p1 = pnand %p361_p0, %p355_p11 }
  0x23   :  { %365 = shalt.err (!%p362_p1)
}
  0x24   :  { %57 = dma.hbm_to_vmem [thread:$0]  %s578_s3, 512, %s52_s8, [#allocation9], %s463_s28, %s463_s28, %s464_s29  }
  0x25   :  { %s366_s22 = scalar_lea.hbm %s575_s0, 128 }
  0x26   :  { %p367_p2 = scmp.ne.s32.totalorder %s575_s0, %s366_s22  ;;  %p370_p3 = scmp.lt.u32.totalorder %s366_s22, %s575_s0 }
  0x28   :  { %p372_p4 = pnand %p370_p3, %p367_p2 }
  0x2a   :  { %375 = shalt.err (!%p372_p4)
}
  0x2b   :  { %s376_s27 = scalar_lea.vmem %s21_s10, 128  ;;  %p381_p6 = scmp.lt.s32.totalorder %s21_s10, %s21_s10 }
  0x2c   :  { %p377_p5 = scmp.ne.s32.totalorder %s21_s10, %s376_s27  ;;  %p382_p7 = scmp.lt.s32.totalorder %s376_s27, %s376_s27 }
  0x2e   :  { %p383_p8 = por %p382_p7, %p381_p6 }
  0x30   :  { %p384_p9 = pnand %p383_p8, %p377_p5 }
  0x32   :  { %387 = shalt.err (!%p384_p9)
}
  0x33   :  { %23 = dma.hbm_to_vmem [thread:$0]  %s575_s0, 128, %s21_s10, [#allocation3]  }
  0x34   :  { %s467_s29 = smov [#allocation7]   ;;  %s468_s6 = smov [#allocation10]  }
  0x35   :  { %s42_s30 = sshll.u32 %s467_s29, 4  ;;  %s64_s7 = sshll.u32 %s468_s6, 4  ;;  %s43_s30 = int_to_ptr.vmem [resolvable:$true] %s42_s30  ;;  %s65_s7 = int_to_ptr.vmem [resolvable:$true] %s64_s7 }
  0x36   :  { %s388_s11 = scalar_lea.hbm %s577_s2, 16 }
  0x37   :  { %p389_p10 = scmp.ne.s32.totalorder %s577_s2, %s388_s11  ;;  %p392_p11 = scmp.lt.u32.totalorder %s388_s11, %s577_s2 }
  0x39   :  { %p394_p12 = pnand %p392_p11, %p389_p10 }
  0x3b   :  { %397 = shalt.err (!%p394_p12)
}
  0x3c   :  { %s398_s0 = scalar_lea.vmem %s43_s30, 16  ;;  %s402_s10 = scalar_lea.vmem %s43_s30, 32 }
  0x3d   :  { %p399_p13 = scmp.ne.s32.totalorder %s43_s30, %s398_s0  ;;  %p403_p0 = scmp.lt.s32.totalorder %s43_s30, %s43_s30 }
  0x3e   :  { %p404_p1 = scmp.lt.s32.totalorder %s402_s10, %s398_s0 }
  0x40   :  { %p405_p2 = por %p404_p1, %p403_p0 }
  0x42   :  { %p406_p3 = pnand %p405_p2, %p399_p13 }
  0x44   :  { %409 = shalt.err (!%p406_p3)
}
  0x45   :  { %45 = dma.hbm_to_vmem [thread:$0]  %s577_s2, 16, %s43_s30, [#allocation6]  }
  0x46   :  { %s410_s19 = scalar_lea.hbm %s579_s4, 16 }
  0x47   :  { %p411_p4 = scmp.ne.s32.totalorder %s579_s4, %s410_s19  ;;  %p414_p5 = scmp.lt.u32.totalorder %s410_s19, %s579_s4 }
  0x49   :  { %p416_p6 = pnand %p414_p5, %p411_p4 }
  0x4b   :  { %419 = shalt.err (!%p416_p6)
}
  0x4c   :  { %s420_s24 = scalar_lea.vmem %s65_s7, 16  ;;  %s424_s25 = scalar_lea.vmem %s65_s7, 32 }
  0x4d   :  { %p421_p7 = scmp.ne.s32.totalorder %s65_s7, %s420_s24  ;;  %p425_p8 = scmp.lt.s32.totalorder %s65_s7, %s65_s7 }
  0x4e   :  { %p426_p9 = scmp.lt.s32.totalorder %s424_s25, %s420_s24 }
  0x50   :  { %p427_p10 = por %p426_p9, %p425_p8 }
  0x52   :  { %p428_p11 = pnand %p427_p10, %p421_p7 }
  0x54   :  { %431 = shalt.err (!%p428_p11)
}
  0x55   :  { %67 = dma.hbm_to_vmem [thread:$0]  %s579_s4, 16, %s65_s7, [#allocation9]  }
  0x56   :  { %454 = dma.done.wait [#allocation3], 128  }
  0x57   :  { %455 = vsyncadd [#allocation3], 4294967168 }
  0x58   :  { %456 = dma.done.wait [#allocation6], 272  }
  0x59   :  { %457 = vsyncadd [#allocation6], 4294967024 }
  0x5a   :  { %458 = dma.done.wait [#allocation9], 528  }
  0x5b   :  { %459 = vsyncadd [#allocation9], 4294966768  ;;  %v469_v0 = vmov 0.0|0.0   ;;  %vm470_vm0 = vmmov 0   ;;  %v471_v1 = vmov 0.0   ;;  %v84_v2 = vld [vmem:[#allocation5] sm:$0xff] }
  0x5c   :  { %302 = vmatprep.subr.bf16.mxu0 %v469_v0  ;;  %288 = vmatprep.mubr.msk.f32.mxu0 %vm470_vm0, %v471_v1  ;;  %v85_v3 = vld [vmem:[#allocation5 + $0x8] sm:$0xff]  ;;  %v168_v5 = vld [vmem:[#allocation8] sm:$0xff]  ;;  %v169_v6 = vld [vmem:[#allocation8 + $0x8] sm:$0xff]  ;;  %vm93_vm1 = vcmask 130048   ;;  %vm179_vm2 = vcmask 261120   ;;  %s472_s4 = smov [#allocation11]  }
  0x5d   :  { %305 = vmatprep.subr.bf16.mxu1 %v469_v0  ;;  %299 = vmatprep.mubr.msk.f32.mxu1 %vm470_vm0, %v471_v1  ;;  %v303_v4 = vpack.c.bf16 %v85_v3, %v84_v2  ;;  %v306_v7 = vpack.c.bf16 %v169_v6, %v168_v5  ;;  %v83_v8 = vld [vmem:[#allocation2] sm:$0xff]  ;;  %v170_v9 = vld [vmem:[#allocation8 + $0x10] sm:$0xff]  ;;  %v171_v10 = vld [vmem:[#allocation8 + $0x18] sm:$0xff]  ;;  %s261_s27 = sshll.u32 %s472_s4, 4  ;;  %vm253_vm3 = vcmask 31744   ;;  %s262_s27 = int_to_ptr.vmem [resolvable:$true] %s261_s27 }
  0x5e   :  { %v309_v11 = vpack.c.bf16 %v171_v10, %v170_v9  ;;  %v272_v12 = vld [vmem:[#allocation7] ss:$0 sm:$0xff]  ;;  %v274_v17 = vld [vmem:[#allocation10] ss:$0 sm:$0xff]  ;;  %s432_s3 = scalar_lea.vmem %s262_s27, 128  ;;  %p437_p13 = scmp.lt.s32.totalorder %s262_s27, %s262_s27 }
  0x5f   :  { %304 = vmatpush3.bf16.msra.mxu0 %v303_v4  ;;  %307 = vmatpush3.bf16.msra.mxu1 %v306_v7  ;;  %p433_p12 = scmp.ne.s32.totalorder %s262_s27, %s432_s3  ;;  %p438_p0 = scmp.lt.s32.totalorder %s432_s3, %s432_s3 }
  0x60   :  { %308 = vmatprep.subr.bf16.mxu1 %v469_v0 }
  0x61   :  { %p439_p1 = por %p438_p0, %p437_p13 }
  0x62   :  { %289 = vmatmul.mubr.msk.f32.vlgmr.msra.gmra.mrb[0].mxu0 %vm93_vm1, %v83_v8 }
  0x63   :  { %310 = vmatpush3.bf16.msra.mxu1 %v309_v11  ;;  %p440_p2 = pnand %p439_p1, %p433_p12 }
 0x135   :  { %v163_v13 = vpop.f32.mrb[0].mxu0 }
 0x136   :  { %v164_v14 = vadd.f32 %v272_v12, %v163_v13  ;;  %v290_v15 = vpop.f32.mrb[1].mxu0 }
 0x138   :  { %v167_v16 = vmax.f32 %v164_v14, 0.0 }
 0x13a   :  { %300 = vmatmul.mubr.msk.f32.vlgmr.msra.gmra.mrb[0].mxu1 %vm179_vm2, %v167_v16 }
 0x20d   :  { %v249_v18 = vpop.f32.mrb[0].mxu1 }
 0x20e   :  { %v250_v19 = vadd.f32 %v274_v17, %v249_v18  ;;  %v301_v20 = vpop.f32.mrb[1].mxu1 }
 0x210   :  { %254 = vst.msk [vmem:[#allocation11] sm:$0xff] %vm253_vm3, %v250_v19 }
 0x211   :  { %443 = shalt.err (!%p440_p2)
}
 0x212   :  { %s444_s30 = scalar_lea.hbm %s580_s5, 128 }
 0x213   :  { %p445_p3 = scmp.ne.s32.totalorder %s580_s5, %s444_s30  ;;  %p448_p4 = scmp.lt.u32.totalorder %s444_s30, %s580_s5 }
 0x215   :  { %p450_p5 = pnand %p448_p4, %p445_p3 }
 0x217   :  { %453 = shalt.err (!%p450_p5)
}
 0x218   :  { %264 = dma.vmem_to_hbm [thread:$0]  %s262_s27, 128, %s580_s5, [#allocation4]  }
 0x219   :  { %460 = dma.done.wait [#allocation4], 128  }
 0x21a   :  { %461 = vsyncadd [#allocation4], 4294967168 }
 0x21b   :  { %268 = vsyncpa [#allocation3], 1 }
 0x21c   :  { %269 = vsyncpa [#allocation6], 1 }
 0x21d   :  { %270 = vsyncpa [#allocation9], 1 }
 0x21e   :  { %271 = vsyncpa [#allocation4], 1 }

</bundles_post_ra>
